<compile_context>
chip_gen: v7x
topology: tpu7x:2x2x1
jax: 0.10.0
libtpu: 0.0.40
codegen_flags: <defaults>
</compile_context>

<pallas_src>
import functools

import jax
import jax.numpy as jnp
from jax import lax
from jax.experimental import pallas as pl
from jax.experimental.pallas import tpu as pltpu

LR = 1e-3                      # SGD learning rate of the wrapped optimizer
_VMEM_BUDGET = 48 << 20        # keep resident set well under v7x's 64 MiB


def _round_up(v, m):
    return ((v + m - 1) // m) * m


def _mxu_lane_align():
    """256-aligned shapes for the 2x256 MXU on v6e/v7x, 128 otherwise."""
    try:
        kind = jax.devices()[0].device_kind.lower()
    except Exception:
        return 128
    return 256 if ("v6" in kind or "v7" in kind) else 128


def _tent_kernel(x_ref, w_ref, b_ref,
                 logits_ref, loss_ref, new_w_ref, new_b_ref,
                 gwt_acc, gb_acc,
                 *, batch, num_classes, lr, mask_rows, mask_cols):
    i = pl.program_id(0)
    n_tiles = pl.num_programs(0)
    inv_batch = jnp.float32(1.0 / batch)

    @pl.when(i == 0)
    def _init():
        gwt_acc[...] = jnp.zeros_like(gwt_acc)
        gb_acc[...] = jnp.zeros_like(gb_acc)
        loss_ref[0, 0] = jnp.float32(0.0)

    x = x_ref[...]                                          # (tb, Dp) native dtype

    # --- model forward on the MXU (no up-cast: MXU widens bf16 natively) ---
    logits = jnp.dot(x, w_ref[...], preferred_element_type=jnp.float32)
    logits = logits + b_ref[...].astype(jnp.float32)        # (tb, Cp) f32
    logits_ref[...] = logits.astype(logits_ref.dtype)

    tb, cp = logits.shape

    # Padded class columns pushed to -1e30 (finite): exp -> exactly 0, so all
    # downstream products (p*logp, dlogits) are exactly 0 there without extra
    # wheres.  Compile-time fast path skips the mask entirely when C == Cp.
    if mask_cols:
        col_ids = lax.broadcasted_iota(jnp.int32, (tb, cp), 1)
        logits = jnp.where(col_ids < num_classes, logits, jnp.float32(-1e30))

    # --- softmax entropy (exact path; p derived from log_softmax) ---
    m = jnp.max(logits, axis=1, keepdims=True)
    z = logits - m
    se = jnp.sum(jnp.exp(z), axis=1, keepdims=True)
    logp = z - jnp.log(se)                                  # log_softmax
    p = jnp.exp(logp)                                       # softmax (exact)
    ent = -jnp.sum(p * logp, axis=1, keepdims=True)         # (tb, 1)

    if mask_rows:
        row_valid = (i * tb
                     + lax.broadcasted_iota(jnp.int32, (tb, 1), 0)) < batch
        ent = jnp.where(row_valid, ent, 0.0)

    loss_ref[0, 0] = loss_ref[0, 0] + jnp.sum(ent) * inv_batch

    # --- backward of mean entropy: dL/dlogits = -p * (log p + H) / B ---
    dlogits = -(p * (logp + ent)) * inv_batch               # (tb, Cp) f32
    if mask_rows:
        dlogits = jnp.where(row_valid, dlogits, 0.0)

    # grad_W^T accumulate: contract batch dim of both operands.  The operand
    # that needs a layout transpose is the small (tb, Cp) dlogits tile, not the
    # (tb, Dp) x tile; result lands in (Cp, Dp) and is transposed once at the
    # end.  (This is why we keep a separate f32 accumulator instead of folding
    # the SGD step into new_w_ref per tile.)
    gwt_acc[...] += lax.dot_general(
        dlogits.astype(x.dtype), x,
        dimension_numbers=(((0,), (0,)), ((), ())),
        preferred_element_type=jnp.float32)                 # (Cp, Dp)
    gb_acc[...] += jnp.sum(dlogits, axis=0, keepdims=True)  # (1, Cp)

    # --- optimizer.step() (plain SGD), once after the last batch tile ---
    @pl.when(i == n_tiles - 1)
    def _finalize():
        new_w_ref[...] = (w_ref[...].astype(jnp.float32)
                          - lr * gwt_acc[...].T).astype(new_w_ref.dtype)
        new_b_ref[...] = (b_ref[...].astype(jnp.float32)
                          - lr * gb_acc[...]).astype(new_b_ref.dtype)


def tent_forward_and_adapt(x, w, b, *, lr=LR, batch_tile=256, lane_align=None):
    """One Tent adaptation step.  Returns (logits, loss, new_w, new_b)."""
    B, D = x.shape
    D2, C = w.shape
    assert D2 == D
    b = b.reshape(1, C)

    if lane_align is None:
        lane_align = _mxu_lane_align()

    Dp = _round_up(D, lane_align)
    Cp = _round_up(C, lane_align)

    # Sublane packing: bf16 packs 2 rows / sublane, int8 packs 4.
    sub_mult = {1: 32, 2: 16, 4: 8}.get(x.dtype.itemsize, 8)
    tb = min(_round_up(batch_tile, sub_mult), _round_up(B, sub_mult))

    xsz = x.dtype.itemsize
    wsz = w.dtype.itemsize

    def _vmem_bytes(tbv):
        return (4 * Dp * Cp * wsz         # W + new_W blocks, double-buffered
                + 4 * Dp * Cp             # grad_W^T f32 accumulator
                + 2 * tbv * Dp * xsz      # x tile, double-buffered
                + 2 * tbv * Cp * 4        # logits tile, double-buffered
                + 16 * Cp * 4)            # b / new_b / grad_b

    # Shrink the batch tile until the resident set fits the VMEM budget
    # (matters for large D*C on v7x's 64 MiB VMEM).
    while _vmem_bytes(tb) > _VMEM_BUDGET and tb > sub_mult:
        tb = max(sub_mult, _round_up(tb // 2, sub_mult))

    grid_b = pl.cdiv(B, tb)
    Bp = grid_b * tb

    pad_b, pad_d = Bp - B, Dp - D
    # Only materialize padded copies when actually needed (avoids an extra full
    # HBM pass over x in the common aligned case).
    xp = jnp.pad(x, ((0, pad_b), (0, pad_d))) if (pad_b or pad_d) else x
    wp = jnp.pad(w, ((0, Dp - D), (0, Cp - C))) if (Dp != D or Cp != C) else w
    bp = jnp.pad(b, ((0, 0), (0, Cp - C))) if Cp != C else b

    kernel = functools.partial(
        _tent_kernel, batch=B, num_classes=C, lr=lr,
        mask_rows=(pad_b != 0), mask_cols=(Cp != C))

    vmem_limit = int(min(max(_vmem_bytes(tb) * 5 // 4 + (4 << 20), 32 << 20),
                         48 << 20))

    logits_p, loss, new_w_p, new_b_p = pl.pallas_call(
        kernel,
        out_shape=(
            jax.ShapeDtypeStruct((Bp, Cp), x.dtype),      # logits
            jax.ShapeDtypeStruct((1, 1), jnp.float32),    # loss (SMEM scalar)
            jax.ShapeDtypeStruct((Dp, Cp), wp.dtype),     # updated W (aliases wp)
            jax.ShapeDtypeStruct((1, Cp), bp.dtype),      # updated b (aliases bp)
        ),
        grid_spec=pltpu.PrefetchScalarGridSpec(
            num_scalar_prefetch=0,
            grid=(grid_b,),
            in_specs=[
                pl.BlockSpec((tb, Dp), lambda i: (i, 0)),   # x: streamed per tile
                pl.BlockSpec((Dp, Cp), lambda i: (0, 0)),   # W: VMEM-resident
                pl.BlockSpec((1, Cp), lambda i: (0, 0)),    # b: VMEM-resident
            ],
            out_specs=(
                pl.BlockSpec((tb, Cp), lambda i: (i, 0)),   # logits: per tile
                pl.BlockSpec(memory_space=pltpu.MemorySpace.SMEM),  # loss scalar
                pl.BlockSpec((Dp, Cp), lambda i: (0, 0)),   # new W: written once
                pl.BlockSpec((1, Cp), lambda i: (0, 0)),    # new b: written once
            ),
            scratch_shapes=[
                pltpu.VMEM((Cp, Dp), jnp.float32),          # grad_W^T accumulator
                pltpu.VMEM((1, Cp), jnp.float32),           # grad_b accumulator
            ],
        ),
        input_output_aliases={1: 2, 2: 3},   # W->new_W, b->new_b (in-place step)
        compiler_params=pltpu.CompilerParams(
            dimension_semantics=("arbitrary",),  # batch axis carries the reduction
            vmem_limit_bytes=vmem_limit),
    )(xp, wp, bp)

    return (logits_p[:B, :C], loss[0, 0],
            new_w_p[:D, :C], new_b_p[:1, :C])


def _reference(x, w, b, lr=LR):
    logits = x @ w + b
    p = jax.nn.softmax(logits, axis=1)
    logp = jax.nn.log_softmax(logits, axis=1)
    loss = (-(p * logp).sum(1)).mean(0)

    def loss_fn(params):
        w_, b_ = params
        lg = x @ w_ + b_
        return (-(jax.nn.softmax(lg, 1) * jax.nn.log_softmax(lg, 1)).sum(1)).mean()

    gw, gb = jax.grad(loss_fn)((w, b))
    return logits, loss, w - lr * gw, b - lr * gb


def _check(x, w, b, **kw):
    r_logits, r_loss, r_w, r_b = _reference(x, w, b)
    logits, loss, new_w, new_b = tent_forward_and_adapt(x, w, b, **kw)
    jax.block_until_ready((logits, loss, new_w, new_b))
    assert jnp.allclose(logits, r_logits, atol=1e-4, rtol=1e-4)
    assert jnp.allclose(loss, r_loss, atol=1e-3, rtol=1e-3)
    assert jnp.allclose(new_w, r_w, atol=1e-4, rtol=1e-4)
    assert jnp.allclose(new_b, r_b, atol=1e-4, rtol=1e-4)


if __name__ == "__main__":
    D, C = 32, 16
    key = jax.random.PRNGKey(0)
    kx, kw, kb, kx2 = jax.random.split(key, 4)
    w = jax.random.normal(kw, (D, C), dtype=jnp.float32) * 0.1
    b = jax.random.normal(kb, (1, C), dtype=jnp.float32) * 0.1

    # Case 1: aligned batch, single tile (fast path: no row mask).
    x1 = jax.random.normal(kx, (8, D), dtype=jnp.float32)
    _check(x1, w, b)

    # Case 2: ragged batch across multiple tiles (row mask + grid accumulation
    # + finalize on the last tile).
    x2 = jax.random.normal(kx2, (20, D), dtype=jnp.float32)
    _check(x2, w, b, batch_tile=8)

    print("KERNEL_OK")
</pallas_src>

<mosaic_0001>
module attributes {stable_mosaic.version = 11 : i64} {
  func.func @_tent_kernel(%arg0: i32, %arg1: memref<8x128xf32, #tpu.memory_space<vmem>>, %arg2: memref<128x128xf32, #tpu.memory_space<vmem>>, %arg3: memref<1x128xf32, #tpu.memory_space<vmem>>, %arg4: memref<8x128xf32, #tpu.memory_space<vmem>>, %arg5: memref<1x1xf32, #tpu.memory_space<smem>>, %arg6: memref<128x128xf32, #tpu.memory_space<vmem>>, %arg7: memref<1x128xf32, #tpu.memory_space<vmem>>, %arg8: memref<128x128xf32, #tpu.memory_space<vmem>>, %arg9: memref<1x128xf32, #tpu.memory_space<vmem>>) attributes {dimension_semantics = [#tpu.dimension_semantics<arbitrary>], iteration_bounds = array<i64: 1>, scalar_prefetch = 0 : i64, scratch_operands = 2 : i64, tpu.core_type = #tpu.core_type<tc>, window_params = [{transform_indices = @transform_0, window_bounds = array<i64: 8, 128>}, {pipeline_mode = #tpu.pipeline_mode<synchronous>, transform_indices = @transform_1, window_bounds = array<i64: 128, 128>}, {pipeline_mode = #tpu.pipeline_mode<synchronous>, transform_indices = @transform_2, window_bounds = array<i64: 1, 128>}, {transform_indices = @transform_3, window_bounds = array<i64: 8, 128>}, {transform_indices = @transform_4, window_bounds = array<i64: 1, 1>}, {pipeline_mode = #tpu.pipeline_mode<synchronous>, transform_indices = @transform_5, window_bounds = array<i64: 128, 128>}, {pipeline_mode = #tpu.pipeline_mode<synchronous>, transform_indices = @transform_6, window_bounds = array<i64: 1, 128>}]} {
    %c0_i32 = arith.constant 0 : i32
    %0 = arith.cmpi eq, %arg0, %c0_i32 : i32
    %1 = arith.extui %0 : i1 to i32
    %c0_i32_0 = arith.constant 0 : i32
    %2 = arith.cmpi ne, %1, %c0_i32_0 : i32
    scf.if %2 {
      %cst_33 = arith.constant 0.000000e+00 : f32
      %58 = vector.broadcast %cst_33 : f32 to vector<128x128xf32>
      %c0_34 = arith.constant 0 : index
      %c0_35 = arith.constant 0 : index
      %59 = vector.load %arg8[%c0_34, %c0_35] : memref<128x128xf32, #tpu.memory_space<vmem>>, vector<128x128xf32>
      tpu.vector_store %arg8[%c0_34, %c0_35], %58 {strides = array<i32>} : memref<128x128xf32, #tpu.memory_space<vmem>>, vector<128x128xf32>,
      %cst_36 = arith.constant 0.000000e+00 : f32
      %60 = vector.broadcast %cst_36 : f32 to vector<1x128xf32>
      %c0_37 = arith.constant 0 : index
      %c0_38 = arith.constant 0 : index
      %61 = vector.load %arg9[%c0_37, %c0_38] : memref<1x128xf32, #tpu.memory_space<vmem>>, vector<1x128xf32>
      tpu.vector_store %arg9[%c0_37, %c0_38], %60 {strides = array<i32>} : memref<1x128xf32, #tpu.memory_space<vmem>>, vector<1x128xf32>,
      %cst_39 = arith.constant 0.000000e+00 : f32
      %c0_40 = arith.constant 0 : index
      %c0_41 = arith.constant 0 : index
      %62 = memref.load %arg5[%c0_40, %c0_41] : memref<1x1xf32, #tpu.memory_space<smem>>
      memref.store %cst_39, %arg5[%c0_40, %c0_41] : memref<1x1xf32, #tpu.memory_space<smem>>
    } else {
    }
    %c0 = arith.constant 0 : index
    %c0_1 = arith.constant 0 : index
    %3 = vector.load %arg1[%c0, %c0_1] : memref<8x128xf32, #tpu.memory_space<vmem>>, vector<8x128xf32>
    %c0_2 = arith.constant 0 : index
    %c0_3 = arith.constant 0 : index
    %4 = vector.load %arg2[%c0_2, %c0_3] : memref<128x128xf32, #tpu.memory_space<vmem>>, vector<128x128xf32>
    %cst = arith.constant dense<0.000000e+00> : vector<8x128xf32>
    %5 = tpu.matmul %3, %4, %cst {dimension_numbers = #tpu.dot_dimension_numbers<[1], [0], [0], [1], [0, 0, 1, 1], [], []>} : vector<8x128xf32>, vector<128x128xf32>, vector<8x128xf32> -> vector<8x128xf32>
    %c0_4 = arith.constant 0 : index
    %c0_5 = arith.constant 0 : index
    %6 = vector.load %arg3[%c0_4, %c0_5] : memref<1x128xf32, #tpu.memory_space<vmem>>, vector<1x128xf32>
    %7 = vector.broadcast %6 : vector<1x128xf32> to vector<8x128xf32>
    %8 = arith.addf %5, %7 : vector<8x128xf32>
    %c0_6 = arith.constant 0 : index
    %c0_7 = arith.constant 0 : index
    %9 = vector.load %arg4[%c0_6, %c0_7] : memref<8x128xf32, #tpu.memory_space<vmem>>, vector<8x128xf32>
    tpu.vector_store %arg4[%c0_6, %c0_7], %8 {strides = array<i32>} : memref<8x128xf32, #tpu.memory_space<vmem>>, vector<8x128xf32>,
    %10 = tpu.iota {dimensions = array<i32: 1>} : vector<8x128xi32>
    %c16_i32 = arith.constant 16 : i32
    %11 = vector.broadcast %c16_i32 : i32 to vector<8x128xi32>
    %12 = arith.cmpi slt, %10, %11 : vector<8x128xi32>
    %cst_8 = arith.constant -1.000000e+30 : f32
    %13 = vector.broadcast %cst_8 : f32 to vector<8x128xf32>
    %14 = arith.select %12, %8, %13 : vector<8x128xi1>, vector<8x128xf32>
    %cst_9 = arith.constant dense<0xFF800000> : vector<8xf32>
    %15 = vector.multi_reduction <maximumf>, %14, %cst_9 [1] : vector<8x128xf32> to vector<8xf32>
    %16 = vector.shape_cast %15 : vector<8xf32> to vector<8x1xf32>
    %17 = vector.broadcast %16 : vector<8x1xf32> to vector<8x128xf32>
    %18 = arith.subf %14, %17 : vector<8x128xf32>
    %19 = math.exp %18 : vector<8x128xf32>
    %cst_10 = arith.constant dense<0.000000e+00> : vector<8xf32>
    %20 = vector.multi_reduction <add>, %19, %cst_10 [1] : vector<8x128xf32> to vector<8xf32>
    %21 = vector.shape_cast %20 : vector<8xf32> to vector<8x1xf32>
    %22 = math.log %21 : vector<8x1xf32>
    %23 = vector.broadcast %22 : vector<8x1xf32> to vector<8x128xf32>
    %24 = arith.subf %18, %23 : vector<8x128xf32>
    %25 = math.exp %24 : vector<8x128xf32>
    %26 = arith.mulf %25, %24 : vector<8x128xf32>
    %cst_11 = arith.constant dense<0.000000e+00> : vector<8xf32>
    %27 = vector.multi_reduction <add>, %26, %cst_11 [1] : vector<8x128xf32> to vector<8xf32>
    %28 = vector.shape_cast %27 : vector<8xf32> to vector<8x1xf32>
    %cst_12 = arith.constant 0.000000e+00 : f32
    %29 = vector.broadcast %cst_12 : f32 to vector<8x1xf32>
    %30 = arith.subf %29, %28 : vector<8x1xf32>
    %c0_13 = arith.constant 0 : index
    %c0_14 = arith.constant 0 : index
    %31 = memref.load %arg5[%c0_13, %c0_14] : memref<1x1xf32, #tpu.memory_space<smem>>
    %32 = vector.shape_cast %30 : vector<8x1xf32> to vector<1x8x1xf32>
    %cst_15 = arith.constant dense<0.000000e+00> : vector<1xf32>
    %33 = vector.multi_reduction <add>, %32, %cst_15 [1, 2] : vector<1x8x1xf32> to vector<1xf32>
    %34 = vector.shape_cast %33 : vector<1xf32> to vector<1x1x1xf32>
    %35 = vector.extract %34[0, 0, 0] : f32 from vector<1x1x1xf32>
    %cst_16 = arith.constant 1.250000e-01 : f32
    %36 = arith.mulf %35, %cst_16 : f32
    %37 = arith.addf %31, %36 : f32
    %c0_17 = arith.constant 0 : index
    %c0_18 = arith.constant 0 : index
    %38 = memref.load %arg5[%c0_17, %c0_18] : memref<1x1xf32, #tpu.memory_space<smem>>
    memref.store %37, %arg5[%c0_17, %c0_18] : memref<1x1xf32, #tpu.memory_space<smem>>
    %39 = vector.broadcast %30 : vector<8x1xf32> to vector<8x128xf32>
    %40 = arith.addf %24, %39 : vector<8x128xf32>
    %41 = arith.mulf %25, %40 : vector<8x128xf32>
    %cst_19 = arith.constant 0.000000e+00 : f32
    %42 = vector.broadcast %cst_19 : f32 to vector<8x128xf32>
    %43 = arith.subf %42, %41 : vector<8x128xf32>
    %cst_20 = arith.constant 1.250000e-01 : f32
    %44 = vector.broadcast %cst_20 : f32 to vector<8x128xf32>
    %45 = arith.mulf %43, %44 : vector<8x128xf32>
    %c0_21 = arith.constant 0 : index
    %c0_22 = arith.constant 0 : index
    %46 = vector.load %arg8[%c0_21, %c0_22] : memref<128x128xf32, #tpu.memory_space<vmem>>, vector<128x128xf32>
    %cst_23 = arith.constant dense<0.000000e+00> : vector<128x128xf32>
    %47 = tpu.matmul %45, %3, %cst_23 {dimension_numbers = #tpu.dot_dimension_numbers<[0], [0], [1], [1], [0, 1, 1, 1], [], []>} : vector<8x128xf32>, vector<8x128xf32>, vector<128x128xf32> -> vector<128x128xf32>
    %48 = arith.addf %46, %47 : vector<128x128xf32>
    %c0_24 = arith.constant 0 : index
    %c0_25 = arith.constant 0 : index
    %49 = vector.load %arg8[%c0_24, %c0_25] : memref<128x128xf32, #tpu.memory_space<vmem>>, vector<128x128xf32>
    tpu.vector_store %arg8[%c0_24, %c0_25], %48 {strides = array<i32>} : memref<128x128xf32, #tpu.memory_space<vmem>>, vector<128x128xf32>,
    %c0_26 = arith.constant 0 : index
    %c0_27 = arith.constant 0 : index
    %50 = vector.load %arg9[%c0_26, %c0_27] : memref<1x128xf32, #tpu.memory_space<vmem>>, vector<1x128xf32>
    %cst_28 = arith.constant dense<0.000000e+00> : vector<128xf32>
    %51 = vector.multi_reduction <add>, %45, %cst_28 [0] : vector<8x128xf32> to vector<128xf32>
    %52 = vector.shape_cast %51 : vector<128xf32> to vector<1x128xf32>
    %53 = arith.addf %50, %52 : vector<1x128xf32>
    %c0_29 = arith.constant 0 : index
    %c0_30 = arith.constant 0 : index
    %54 = vector.load %arg9[%c0_29, %c0_30] : memref<1x128xf32, #tpu.memory_space<vmem>>, vector<1x128xf32>
    tpu.vector_store %arg9[%c0_29, %c0_30], %53 {strides = array<i32>} : memref<1x128xf32, #tpu.memory_space<vmem>>, vector<1x128xf32>,
    %c0_i32_31 = arith.constant 0 : i32
    %55 = arith.cmpi eq, %arg0, %c0_i32_31 : i32
    %56 = arith.extui %55 : i1 to i32
    %c0_i32_32 = arith.constant 0 : i32
    %57 = arith.cmpi ne, %56, %c0_i32_32 : i32
    scf.if %57 {
      %c0_33 = arith.constant 0 : index
      %c0_34 = arith.constant 0 : index
      %58 = vector.load %arg2[%c0_33, %c0_34] : memref<128x128xf32, #tpu.memory_space<vmem>>, vector<128x128xf32>
      %c0_35 = arith.constant 0 : index
      %c0_36 = arith.constant 0 : index
      %59 = vector.load %arg8[%c0_35, %c0_36] : memref<128x128xf32, #tpu.memory_space<vmem>>, vector<128x128xf32>
      %60 = tpu.transpose %59, [1, 0] : vector<128x128xf32> -> vector<128x128xf32>
      %cst_37 = arith.constant 1.000000e-03 : f32
      %61 = vector.broadcast %cst_37 : f32 to vector<128x128xf32>
      %62 = arith.mulf %61, %60 : vector<128x128xf32>
      %63 = arith.subf %58, %62 : vector<128x128xf32>
      %c0_38 = arith.constant 0 : index
      %c0_39 = arith.constant 0 : index
      %64 = vector.load %arg6[%c0_38, %c0_39] : memref<128x128xf32, #tpu.memory_space<vmem>>, vector<128x128xf32>
      tpu.vector_store %arg6[%c0_38, %c0_39], %63 {strides = array<i32>} : memref<128x128xf32, #tpu.memory_space<vmem>>, vector<128x128xf32>,
      %c0_40 = arith.constant 0 : index
      %c0_41 = arith.constant 0 : index
      %65 = vector.load %arg3[%c0_40, %c0_41] : memref<1x128xf32, #tpu.memory_space<vmem>>, vector<1x128xf32>
      %c0_42 = arith.constant 0 : index
      %c0_43 = arith.constant 0 : index
      %66 = vector.load %arg9[%c0_42, %c0_43] : memref<1x128xf32, #tpu.memory_space<vmem>>, vector<1x128xf32>
      %cst_44 = arith.constant 1.000000e-03 : f32
      %67 = vector.broadcast %cst_44 : f32 to vector<1x128xf32>
      %68 = arith.mulf %67, %66 : vector<1x128xf32>
      %69 = arith.subf %65, %68 : vector<1x128xf32>
      %c0_45 = arith.constant 0 : index
      %c0_46 = arith.constant 0 : index
      %70 = vector.load %arg7[%c0_45, %c0_46] : memref<1x128xf32, #tpu.memory_space<vmem>>, vector<1x128xf32>
      tpu.vector_store %arg7[%c0_45, %c0_46], %69 {strides = array<i32>} : memref<1x128xf32, #tpu.memory_space<vmem>>, vector<1x128xf32>,
    } else {
    }
    return
  }
  func.func @transform_0(%arg0: i32) -> (i32, i32) {
    %c0_i32 = arith.constant 0 : i32
    %c0_i32_0 = arith.constant 0 : i32
    return %arg0, %c0_i32 : i32, i32
  }
  func.func @transform_1(%arg0: i32) -> (i32, i32) {
    %c0_i32 = arith.constant 0 : i32
    %c0_i32_0 = arith.constant 0 : i32
    %c0_i32_1 = arith.constant 0 : i32
    return %c0_i32, %c0_i32_0 : i32, i32
  }
  func.func @transform_2(%arg0: i32) -> (i32, i32) {
    %c0_i32 = arith.constant 0 : i32
    %c0_i32_0 = arith.constant 0 : i32
    %c0_i32_1 = arith.constant 0 : i32
    return %c0_i32, %c0_i32_0 : i32, i32
  }
  func.func @transform_3(%arg0: i32) -> (i32, i32) {
    %c0_i32 = arith.constant 0 : i32
    %c0_i32_0 = arith.constant 0 : i32
    return %arg0, %c0_i32 : i32, i32
  }
  func.func @transform_4(%arg0: i32) -> (i32, i32) {
    %c0_i32 = arith.constant 0 : i32
    %c0_i32_0 = arith.constant 0 : i32
    %c0_i32_1 = arith.constant 0 : i32
    return %c0_i32, %c0_i32_0 : i32, i32
  }
  func.func @transform_5(%arg0: i32) -> (i32, i32) {
    %c0_i32 = arith.constant 0 : i32
    %c0_i32_0 = arith.constant 0 : i32
    %c0_i32_1 = arith.constant 0 : i32
    return %c0_i32, %c0_i32_0 : i32, i32
  }
  func.func @transform_6(%arg0: i32) -> (i32, i32) {
    %c0_i32 = arith.constant 0 : i32
    %c0_i32_0 = arith.constant 0 : i32
    %c0_i32_1 = arith.constant 0 : i32
    return %c0_i32, %c0_i32_0 : i32, i32
  }
}

</mosaic_0001>

<bundles_post_ra>
// kernel: tpu_custom_call.1
= control target key start
LH: loop header
LB: loop body
LE: loop exit
PB: predicated region body
PF: predicated region fallthrough
CT: control target
= control target key end

     0   :  { %12 = vsyncpa [#allocation5], 0  ;;  %s1159_s0 = inlined_call_operand.vmem [shape: f32[8,128], index: 0, kind: input, shape index: {}]   ;;  %s1160_s1 = inlined_call_operand.hbm [shape: f32[128,128], index: 1, kind: input, shape index: {}, may-alias: {1,5}]   ;;  %s1161_s2 = inlined_call_operand.hbm [shape: f32[1,128], index: 2, kind: input, shape index: {}, may-alias: {2,6}]   ;;  %s1162_s3 = inlined_call_operand.hbm [shape: f32[8,128], index: 3, kind: output, shape index: {0}]   ;;  %s1163_s4 = inlined_call_operand.hbm [shape: f32[1,1], index: 4, kind: output, shape index: {1}]   ;;  %s1164_s5 = inlined_call_operand.hbm [shape: f32[128,128], index: 5, kind: output, shape index: {2}, may-alias: {1,5}]   ;;  %s1165_s6 = inlined_call_operand.hbm [shape: f32[1,128], index: 6, kind: output, shape index: {3}, may-alias: {2,6}]  }
   0x1   :  { %13 = vsyncpa [#allocation9], 0 }
   0x2   :  { %14 = vsyncpa [#allocation6], 0 }
   0x3   :  { %15 = vsyncpa [#allocation7], 0 }
   0x4   :  { %16 = vsyncpa [#allocation13], 0  ;;  %s952_s21 = smov [#allocation4]   ;;  %s822_s25 = scalar_lea.hbm %s1160_s1, 2048 }
   0x5   :  { %s24_s22 = sshll.u32 %s952_s21, 4  ;;  %p823_p0 = scmp.ne.s32.totalorder %s1160_s1, %s822_s25  ;;  %s25_s22 = int_to_ptr.vmem [resolvable:$true] %s24_s22 }
   0x6   :  { %p826_p1 = scmp.lt.u32.totalorder %s822_s25, %s1160_s1 }
   0x8   :  { %p828_p2 = pnand %p826_p1, %p823_p0 }
   0xa   :  { %831 = shalt.err (!%p828_p2)
}
   0xb   :  { %s832_s30 = scalar_lea.vmem %s25_s22, 2048  ;;  %p837_p4 = scmp.lt.s32.totalorder %s25_s22, %s25_s22 }
   0xc   :  { %p833_p3 = scmp.ne.s32.totalorder %s25_s22, %s832_s30  ;;  %p838_p5 = scmp.lt.s32.totalorder %s832_s30, %s832_s30 }
   0xe   :  { %p839_p6 = por %p838_p5, %p837_p4 }
  0x10   :  { %p840_p7 = pnand %p839_p6, %p833_p3 }
  0x12   :  { %843 = shalt.err (!%p840_p7)
}
  0x13   :  { %s953_s7 = smov 128   ;;  %s954_s8 = smov 8  }
  0x14   :  { %30 = dma.hbm_to_vmem [thread:$0]  %s1160_s1, 2048, %s25_s22, [#allocation5], %s953_s7, %s953_s7, %s954_s8  }
  0x15   :  { %s955_s11 = smov [#allocation8]   ;;  %s844_s15 = scalar_lea.hbm %s1161_s2, 16 }
  0x16   :  { %s37_s12 = sshll.u32 %s955_s11, 4  ;;  %p845_p8 = scmp.ne.s32.totalorder %s1161_s2, %s844_s15  ;;  %s38_s12 = int_to_ptr.vmem [resolvable:$true] %s37_s12 }
  0x17   :  { %p848_p9 = scmp.lt.u32.totalorder %s844_s15, %s1161_s2 }
  0x19   :  { %p850_p10 = pnand %p848_p9, %p845_p8 }
  0x1b   :  { %853 = shalt.err (!%p850_p10)
}
  0x1c   :  { %s854_s20 = scalar_lea.vmem %s38_s12, 16  ;;  %s858_s1 = scalar_lea.vmem %s38_s12, 32 }
  0x1d   :  { %p855_p11 = scmp.ne.s32.totalorder %s38_s12, %s854_s20  ;;  %p859_p12 = scmp.lt.s32.totalorder %s38_s12, %s38_s12 }
  0x1e   :  { %p860_p13 = scmp.lt.s32.totalorder %s858_s1, %s854_s20 }
  0x20   :  { %p861_p0 = por %p860_p13, %p859_p12 }
  0x22   :  { %p862_p1 = pnand %p861_p0, %p855_p11 }
  0x24   :  { %865 = shalt.err (!%p862_p1)
}
  0x25   :  { %40 = dma.hbm_to_vmem [thread:$0]  %s1161_s2, 16, %s38_s12, [#allocation9]  }
  0x26   :  { %942 = dma.done.wait [#allocation5], 2048  }
  0x27   :  { %943 = vsyncadd [#allocation5], 4294965248 }
  0x28   :  { %944 = dma.done.wait [#allocation9], 16  }
  0x29   :  { %945 = vsyncadd [#allocation9], 4294967280  ;;  %v956_v0 = vmov 0.0|0.0   ;;  %v957_v1 = vmov 0.0   ;;  %vm958_vm0 = vmmov 0   ;;  %v1025_v2 = vld [vmem:[#allocation4] sm:$0xff]  ;;  %v165_v27 = vlaneseq }
  0x2a   :  { %778 = vmatprep.subr.bf16.mxu0 %v956_v0  ;;  %67 = vst [vmem:[#allocation3] sm:$0x1] %v957_v1  ;;  %749 = vmatprep.mubr.msk.f32.mxu0 %vm958_vm0, %v957_v1  ;;  %v1027_v3 = vld [vmem:[#allocation4 + $0x8] sm:$0xff]  ;;  %v1029_v4 = vld [vmem:[#allocation4 + $0x10] sm:$0xff]  ;;  %v1033_v6 = vld [vmem:[#allocation4 + $0x18] sm:$0xff]  ;;  %vm186_vm2 = vcmask 7168  }
  0x2b   :  { %v779_v5 = vpack.c.bf16 %v1027_v3, %v1025_v2  ;;  %v782_v7 = vpack.c.bf16 %v1033_v6, %v1029_v4  ;;  %v1037_v8 = vld [vmem:[#allocation4 + $0x20] sm:$0xff]  ;;  %v1039_v9 = vld [vmem:[#allocation4 + $0x28] sm:$0xff]  ;;  %v1046_v12 = vld [vmem:[#allocation4 + $0x30] sm:$0xff]  ;;  %v166_v28 = vand.u32 127, %v165_v27  ;;  %vm253_vm3 = vcmask 64512   ;;  %s959_s25 = smov [#allocation10]  }
  0x2c   :  { %v70_v10 = vld [vmem:[%s1159_s0] sm:$0xff]  ;;  %v785_v11 = vpack.c.bf16 %v1039_v9, %v1037_v8  ;;  %v1054_v16 = vld [vmem:[#allocation4 + $0x48] sm:$0xff]  ;;  %v1058_v18 = vld [vmem:[#allocation4 + $0x50] sm:$0xff]  ;;  %s614_s26 = sshll.u32 %s959_s25, 4  ;;  %s615_s26 = int_to_ptr.vmem [resolvable:$true] %s614_s26 }
  0x2d   :  { %780 = vmatpush3.bf16.msra.mxu0 %v779_v5  ;;  %752 = vmatprep.subr.mxu1 %v70_v10  ;;  %v1048_v13 = vld [vmem:[#allocation4 + $0x38] sm:$0xff]  ;;  %v1052_v15 = vld [vmem:[#allocation4 + $0x40] sm:$0xff]  ;;  %v1066_v22 = vld [vmem:[#allocation4 + $0x68] sm:$0xff]  ;;  %vm167_vm1 = vcmp.lt.s32.totalorder %v166_v28, 16  ;;  %s866_s27 = scalar_lea.vmem %s615_s26, 128  ;;  %p871_p3 = scmp.lt.s32.totalorder %s615_s26, %s615_s26 }
  0x2e   :  { %781 = vmatprep.subr.bf16.mxu0 %v956_v0  ;;  %753 = vmatpush3.msra.mxu1 %v70_v10  ;;  %v788_v14 = vpack.c.bf16 %v1048_v13, %v1046_v12  ;;  %v791_v17 = vpack.c.bf16 %v1054_v16, %v1052_v15  ;;  %v1060_v19 = vld [vmem:[#allocation4 + $0x58] sm:$0xff]  ;;  %v1064_v21 = vld [vmem:[#allocation4 + $0x60] sm:$0xff]  ;;  %v1070_v24 = vld [vmem:[#allocation4 + $0x70] sm:$0xff]  ;;  %p867_p2 = scmp.ne.s32.totalorder %s615_s26, %s866_s27  ;;  %p872_p4 = scmp.lt.s32.totalorder %s866_s27, %s866_s27 }
  0x2f   :  { %v794_v20 = vpack.c.bf16 %v1060_v19, %v1058_v18  ;;  %v797_v23 = vpack.c.bf16 %v1066_v22, %v1064_v21  ;;  %v1072_v25 = vld [vmem:[#allocation4 + $0x78] sm:$0xff]  ;;  %v666_v29 = vld [vmem:[#allocation8] ss:$0 sm:$0xff] }
  0x30   :  { %v800_v26 = vpack.c.bf16 %v1072_v25, %v1070_v24  ;;  %v603_v60 = vld [vmem:[#allocation8] sm:$0x1]  ;;  %p873_p5 = por %p872_p4, %p871_p3 }
  0x31   :  { %783 = vmatpush3.bf16.msra.mxu0 %v782_v7  ;;  %v479_v57 = vld [vmem:[#allocation3] sm:$0x1] }
  0x32   :  { %784 = vmatprep.subr.bf16.mxu0 %v956_v0  ;;  %p874_p6 = pnand %p873_p5, %p867_p2 }
  0x35   :  { %786 = vmatpush3.bf16.msra.mxu0 %v785_v11 }
  0x36   :  { %787 = vmatprep.subr.bf16.mxu0 %v956_v0 }
  0x39   :  { %789 = vmatpush3.bf16.msra.mxu0 %v788_v14 }
  0x3a   :  { %790 = vmatprep.subr.bf16.mxu0 %v956_v0 }
  0x3d   :  { %792 = vmatpush3.bf16.msra.mxu0 %v791_v17 }
  0x3e   :  { %793 = vmatprep.subr.bf16.mxu0 %v956_v0 }
  0x41   :  { %795 = vmatpush3.bf16.msra.mxu0 %v794_v20 }
  0x42   :  { %796 = vmatprep.subr.bf16.mxu0 %v956_v0 }
  0x45   :  { %798 = vmatpush3.bf16.msra.mxu0 %v797_v23 }
  0x46   :  { %799 = vmatprep.subr.bf16.mxu0 %v956_v0 }
  0x49   :  { %801 = vmatpush3.bf16.msra.mxu0 %v800_v26 }
  0x4c   :  { %750 = vmatmul.mubr.f32.vlgmr.msra.gmra.mrb[0].mxu0 %v70_v10 }
 0x11f   :  { %v160_v30 = vpop.f32.mrb[0].mxu0 }
 0x120   :  { %v161_v31 = vadd.f32 %v666_v29, %v160_v30  ;;  %v751_v32 = vpop.f32.mrb[1].mxu0 }
 0x122   :  { %164 = vst [vmem:[#allocation10] sm:$0xff] %v161_v31  ;;  %v168_v33 = vsel %vm167_vm1, %v161_v31, -1e+30 }
 0x123   :  { %169 = vmax.xlane.f32.xlu0 %v168_v33 }
 0x1b0   :  { %v170_v34 = vpop.xlane.xlu0 %169 }
 0x1b1   :  { %v171_v35 = vsub.f32 %v168_v33, %v170_v34 }
 0x1b3   :  { %v172_v36 = vmul.f32 1.442695, %v171_v35 }
 0x1b5   :  { %816 = vpow2.f32 %v172_v36 }
 0x1bf   :  { %v817_v37 = vpop.eup %816 }
 0x1c0   :  { %174 = vadd.xlane.f32.xlu0 %v817_v37 }
 0x24d   :  { %v175_v38 = vpop.xlane.xlu0 %174 }
 0x24e   :  { %818 = vlog2.f32 %v175_v38 }
 0x258   :  { %v819_v39 = vpop.eup %818 }
 0x259   :  { %v177_v40 = vmul.f32 0.6931472, %v819_v39 }
 0x25b   :  { %v178_v41 = vsub.f32 %v171_v35, %v177_v40 }
 0x25d   :  { %v179_v42 = vmul.f32 1.442695, %v178_v41 }
 0x25f   :  { %820 = vpow2.f32 %v179_v42 }
 0x269   :  { %v821_v43 = vpop.eup %820 }
 0x26a   :  { %v181_v44 = vmul.f32 %v821_v43, %v178_v41 }
 0x26c   :  { %182 = vadd.xlane.f32.xlu1 %v181_v44 }
 0x2f9   :  { %v183_v45 = vpop.xlane.xlu1 %182 }
 0x2fa   :  { %v184_v46 = vsub.f32 0.0, %v183_v45 }
 0x2fc   :  { %v201_v47 = vadd.f32 %v184_v46, %v178_v41  ;;  %v187_v48 = vsel %vm186_vm2, %v184_v46, 0.0 }
 0x2fd   :  { %188 = vadd.xlane.f32.xlu0 %v187_v48 }
 0x2fe   :  { %v202_v49 = vmul.f32 %v821_v43, %v201_v47 }
 0x300   :  { %v203_v50 = vsub.f32 0.0, %v202_v49 }
 0x302   :  { %v204_v51 = vmul.f32 0.125, %v203_v50 }
 0x304   :  { %221 = vxpose.xlu1.b32.start.end [1/1] (short) %v204_v51, 128  ;;  %v480_v52 = vrot.slane %v204_v51, 4 }
 0x306   :  { %v481_v53 = vadd.f32 %v480_v52, %v204_v51 }
 0x308   :  { %v482_v54 = vrot.slane %v481_v53, 2 }
 0x30a   :  { %v483_v55 = vadd.f32 %v482_v54, %v481_v53 }
 0x30c   :  { %v484_v56 = vrot.slane %v483_v55, 1 }
 0x30e   :  { %v485_v58 = vadd.f32 %v484_v56, %v483_v55 }
 0x310   :  { %v486_v59 = vadd.f32 %v485_v58, %v479_v57 }
 0x312   :  { %487 = vst [vmem:[#allocation3] sm:$0x1] %v486_v59 }
 0x319   :  { %v604_v61 = vld [vmem:[#allocation3] sm:$0x1] }
 0x31a   :  { %v605_v62 = vmul.f32 0.001, %v604_v61 }
 0x31c   :  { %v606_v63 = vsub.f32 %v603_v60, %v605_v62 }
 0x31e   :  { %607 = vst [vmem:[#allocation14] sm:$0x1] %v606_v63 }
 0x384   :  { %v237_v0 = vpop.trf.xlu1 }
 0x385   :  { %754 = vmatprep.mubr.msk.f32.mxu1 %vm253_vm3, %v237_v0 }
 0x388   :  { %v238_v1 = vpop.trf.xlu1 }
 0x389   :  { %755 = vmatmul.mubr.msk.f32.vlgmr.msra.gmra.mrb[0].mxu1 %vm253_vm3, %v238_v1 }
 0x38a   :  { %v189_v5 = vpop.xlane.xlu0 %188 }
 0x38b   :  { %v190_v7 = vrot.slane %v189_v5, 4 }
 0x38c   :  { %v239_v10 = vpop.trf.xlu1 }
 0x38d   :  { %v191_v11 = vadd.f32 %v190_v7, %v189_v5  ;;  %757 = vmatprep.mubr.msk.f32.mxu1 %vm253_vm3, %v239_v10 }
 0x38f   :  { %v192_v14 = vrot.slane %v191_v11, 2 }
 0x390   :  { %v240_v17 = vpop.trf.xlu1 }
 0x391   :  { %758 = vmatmul.mubr.msk.f32.gmra.mrb[2].mxu1 %vm253_vm3, %v240_v17  ;;  %v193_v20 = vadd.f32 %v192_v14, %v191_v11 }
 0x393   :  { %v194_v23 = vrot.slane %v193_v20, 1 }
 0x394   :  { %v241_v26 = vpop.trf.xlu1 }
 0x395   :  { %760 = vmatprep.mubr.msk.f32.mxu1 %vm253_vm3, %v241_v26  ;;  %v195_v27 = vadd.f32 %v194_v23, %v193_v20 }
 0x397   :  { %802 = vpush %v195_v27 }
 0x398   :  { %v242_v28 = vpop.trf.xlu1 }
 0x399   :  { %761 = vmatmul.mubr.msk.f32.gmra.mrb[4].mxu1 %vm253_vm3, %v242_v28 }
 0x39c   :  { %v243_v29 = vpop.trf.xlu1 }
 0x39d   :  { %763 = vmatprep.mubr.msk.f32.mxu1 %vm253_vm3, %v243_v29 }
 0x3a0   :  { %v244_v30 = vpop.trf.xlu1 }
 0x3a1   :  { %764 = vmatmul.mubr.msk.f32.gmra.mrb[6].mxu1 %vm253_vm3, %v244_v30 }
 0x3a4   :  { %v245_v31 = vpop.trf.xlu1 }
 0x3a5   :  { %766 = vmatprep.mubr.msk.f32.mxu1 %vm253_vm3, %v245_v31 }
 0x3a8   :  { %v246_v32 = vpop.trf.xlu1 }
 0x3a9   :  { %767 = vmatmul.mubr.msk.f32.gmra.mrb[8].mxu1 %vm253_vm3, %v246_v32 }
 0x3ac   :  { %v247_v33 = vpop.trf.xlu1 }
 0x3ad   :  { %769 = vmatprep.mubr.msk.f32.mxu1 %vm253_vm3, %v247_v33 }
 0x3b0   :  { %v248_v34 = vpop.trf.xlu1 }
 0x3b1   :  { %770 = vmatmul.mubr.msk.f32.gmra.mrb[10].mxu1 %vm253_vm3, %v248_v34 }
 0x3b4   :  { %v249_v35 = vpop.trf.xlu1 }
 0x3b5   :  { %772 = vmatprep.mubr.msk.f32.mxu1 %vm253_vm3, %v249_v35 }
 0x3b8   :  { %v250_v36 = vpop.trf.xlu1 }
 0x3b9   :  { %773 = vmatmul.mubr.msk.f32.gmra.mrb[12].mxu1 %vm253_vm3, %v250_v36 }
 0x3bc   :  { %v251_v37 = vpop.trf.xlu1 }
 0x3bd   :  { %775 = vmatprep.mubr.msk.f32.mxu1 %vm253_vm3, %v251_v37 }
 0x3c0   :  { %v252_v38 = vpop.trf.xlu1 }
 0x3c1   :  { %776 = vmatmul.mubr.msk.f32.gmra.mrb[14].mxu1 %vm253_vm3, %v252_v38 }
 0x3c8   :  { %s803_s0 = spop %802 }
 0x3c9   :  { %s197_s24 = smul.f32 0.125, %s803_s0 }
 0x3cb   :  { %200 = sst [smem:[#allocation11]] %s197_s24 }
 0x45c   :  { %v756_v39 = vpop.f32.mrb[0].mxu1 }
 0x45d   :  { %v368_v40 = vpop.f32.mrb[1].mxu1 }
 0x45e   :  { %523 = vxpose.xlu0.b32.start [1/16] %v368_v40, 128 }
 0x462   :  { %524 = vxpose.xlu0.b32.cont [2/16] %v756_v39, 128 }
 0x464   :  { %v759_v41 = vpop.f32.mrb[2].mxu1 }
 0x465   :  { %v378_v42 = vpop.f32.mrb[3].mxu1 }
 0x466   :  { %525 = vxpose.xlu0.b32.cont [3/16] %v378_v42, 128 }
 0x46a   :  { %526 = vxpose.xlu0.b32.cont [4/16] %v759_v41, 128 }
 0x46c   :  { %v762_v43 = vpop.f32.mrb[4].mxu1 }
 0x46d   :  { %v388_v44 = vpop.f32.mrb[5].mxu1 }
 0x46e   :  { %527 = vxpose.xlu0.b32.cont [5/16] %v388_v44, 128 }
 0x472   :  { %528 = vxpose.xlu0.b32.cont [6/16] %v762_v43, 128 }
 0x474   :  { %v765_v45 = vpop.f32.mrb[6].mxu1 }
 0x475   :  { %v398_v46 = vpop.f32.mrb[7].mxu1 }
 0x476   :  { %529 = vxpose.xlu0.b32.cont [7/16] %v398_v46, 128 }
 0x47a   :  { %530 = vxpose.xlu0.b32.cont [8/16] %v765_v45, 128 }
 0x47c   :  { %v768_v47 = vpop.f32.mrb[8].mxu1 }
 0x47d   :  { %v408_v48 = vpop.f32.mrb[9].mxu1 }
 0x47e   :  { %531 = vxpose.xlu0.b32.cont [9/16] %v408_v48, 128 }
 0x482   :  { %532 = vxpose.xlu0.b32.cont [10/16] %v768_v47, 128 }
 0x484   :  { %v771_v49 = vpop.f32.mrb[10].mxu1 }
 0x485   :  { %v418_v50 = vpop.f32.mrb[11].mxu1 }
 0x486   :  { %533 = vxpose.xlu0.b32.cont [11/16] %v418_v50, 128 }
 0x48a   :  { %534 = vxpose.xlu0.b32.cont [12/16] %v771_v49, 128 }
 0x48c   :  { %v774_v51 = vpop.f32.mrb[12].mxu1 }
 0x48d   :  { %v428_v52 = vpop.f32.mrb[13].mxu1 }
 0x48e   :  { %535 = vxpose.xlu0.b32.cont [13/16] %v428_v52, 128 }
 0x492   :  { %536 = vxpose.xlu0.b32.cont [14/16] %v774_v51, 128 }
 0x494   :  { %v777_v53 = vpop.f32.mrb[14].mxu1 }
 0x495   :  { %v438_v54 = vpop.f32.mrb[15].mxu1 }
 0x496   :  { %537 = vxpose.xlu0.b32.cont [15/16] %v438_v54, 128 }
 0x49a   :  { %538 = vxpose.xlu0.b32.end [16/16] %v777_v53, 128 }
 0x49b   :  { %877 = shalt.err (!%p874_p6)
}
 0x49c   :  { %s878_s30 = scalar_lea.hbm %s1162_s3, 128 }
 0x49d   :  { %p879_p7 = scmp.ne.s32.totalorder %s1162_s3, %s878_s30  ;;  %p882_p8 = scmp.lt.u32.totalorder %s878_s30, %s1162_s3 }
 0x49f   :  { %p884_p9 = pnand %p882_p8, %p879_p7 }
 0x4a1   :  { %887 = shalt.err (!%p884_p9)
}
 0x4a2   :  { %617 = dma.vmem_to_hbm [thread:$0]  %s615_s26, 128, %s1162_s3, [#allocation6]  }
 0x4a3   :  { %s888_s17 = scalar_lea.hbm %s1163_s4, 16 }
 0x4a4   :  { %p889_p10 = scmp.ne.s32.totalorder %s1163_s4, %s888_s17  ;;  %p892_p11 = scmp.lt.u32.totalorder %s888_s17, %s1163_s4 }
 0x4a6   :  { %p894_p12 = pnand %p892_p11, %p889_p10 }
 0x4a8   :  { %897 = shalt.err (!%p894_p12)
}
 0x4a9   :  { %s960_s21 = smov [#allocation11]   ;;  %s961_s3 = smov [#allocation12]  }
 0x4aa   :  { %625 = dma.smem_to_hbm %s960_s21, 16, %s1163_s4, [#allocation7]  }
 0x4ab   :  { %s631_s4 = sshll.u32 %s961_s3, 4  ;;  %s962_s23 = smov [#allocation14]   ;;  %s632_s4 = int_to_ptr.vmem [resolvable:$true] %s631_s4 }
 0x4ac   :  { %s644_s0 = sshll.u32 %s962_s23, 4  ;;  %s898_s24 = scalar_lea.vmem %s632_s4, 2048  ;;  %s645_s0 = int_to_ptr.vmem [resolvable:$true] %s644_s0 }
 0x4ad   :  { %p899_p13 = scmp.ne.s32.totalorder %s632_s4, %s898_s24  ;;  %p903_p0 = scmp.lt.s32.totalorder %s632_s4, %s632_s4 }
 0x4ae   :  { %p904_p1 = scmp.lt.s32.totalorder %s898_s24, %s898_s24 }
 0x4b0   :  { %p905_p2 = por %p904_p1, %p903_p0 }
 0x4b2   :  { %p906_p3 = pnand %p905_p2, %p899_p13 }
 0x4de   :  { %v539_v55 = vpop.trf.xlu0 }
 0x4df   :  { %v555_v56 = vmul.f32 0.001, %v539_v55 }
 0x4e1   :  { %v571_v57 = vsub.f32 %v1025_v2, %v555_v56 }
 0x4e2   :  { %v540_v58 = vpop.trf.xlu0 }
 0x4e3   :  { %587 = vst [vmem:[#allocation12] sm:$0xff] %v571_v57  ;;  %v556_v59 = vmul.f32 0.001, %v540_v58 }
 0x4e5   :  { %v572_v60 = vsub.f32 %v1027_v3, %v556_v59 }
 0x4e6   :  { %v541_v61 = vpop.trf.xlu0 }
 0x4e7   :  { %588 = vst [vmem:[#allocation12 + $0x8] sm:$0xff] %v572_v60  ;;  %v557_v62 = vmul.f32 0.001, %v541_v61 }
 0x4e9   :  { %v573_v63 = vsub.f32 %v1029_v4, %v557_v62 }
 0x4ea   :  { %v542_v0 = vpop.trf.xlu0 }
 0x4eb   :  { %589 = vst [vmem:[#allocation12 + $0x10] sm:$0xff] %v573_v63  ;;  %v558_v1 = vmul.f32 0.001, %v542_v0 }
 0x4ed   :  { %v574_v5 = vsub.f32 %v1033_v6, %v558_v1 }
 0x4ee   :  { %v543_v7 = vpop.trf.xlu0 }
 0x4ef   :  { %590 = vst [vmem:[#allocation12 + $0x18] sm:$0xff] %v574_v5  ;;  %v559_v10 = vmul.f32 0.001, %v543_v7 }
 0x4f1   :  { %v575_v2 = vsub.f32 %v1037_v8, %v559_v10 }
 0x4f2   :  { %v544_v11 = vpop.trf.xlu0 }
 0x4f3   :  { %591 = vst [vmem:[#allocation12 + $0x20] sm:$0xff] %v575_v2  ;;  %v560_v14 = vmul.f32 0.001, %v544_v11 }
 0x4f5   :  { %v576_v3 = vsub.f32 %v1039_v9, %v560_v14 }
 0x4f6   :  { %v545_v17 = vpop.trf.xlu0 }
 0x4f7   :  { %592 = vst [vmem:[#allocation12 + $0x28] sm:$0xff] %v576_v3  ;;  %v561_v20 = vmul.f32 0.001, %v545_v17 }
 0x4f9   :  { %v577_v4 = vsub.f32 %v1046_v12, %v561_v20 }
 0x4fa   :  { %v546_v23 = vpop.trf.xlu0 }
 0x4fb   :  { %593 = vst [vmem:[#allocation12 + $0x30] sm:$0xff] %v577_v4  ;;  %v562_v26 = vmul.f32 0.001, %v546_v23 }
 0x4fd   :  { %v578_v6 = vsub.f32 %v1048_v13, %v562_v26 }
 0x4fe   :  { %v547_v27 = vpop.trf.xlu0 }
 0x4ff   :  { %594 = vst [vmem:[#allocation12 + $0x38] sm:$0xff] %v578_v6  ;;  %v563_v28 = vmul.f32 0.001, %v547_v27 }
 0x501   :  { %v579_v8 = vsub.f32 %v1052_v15, %v563_v28 }
 0x502   :  { %v548_v29 = vpop.trf.xlu0 }
 0x503   :  { %595 = vst [vmem:[#allocation12 + $0x40] sm:$0xff] %v579_v8  ;;  %v564_v30 = vmul.f32 0.001, %v548_v29 }
 0x505   :  { %v580_v9 = vsub.f32 %v1054_v16, %v564_v30 }
 0x506   :  { %v549_v31 = vpop.trf.xlu0 }
 0x507   :  { %596 = vst [vmem:[#allocation12 + $0x48] sm:$0xff] %v580_v9  ;;  %v565_v32 = vmul.f32 0.001, %v549_v31 }
 0x509   :  { %v581_v12 = vsub.f32 %v1058_v18, %v565_v32 }
 0x50a   :  { %v550_v33 = vpop.trf.xlu0 }
 0x50b   :  { %597 = vst [vmem:[#allocation12 + $0x50] sm:$0xff] %v581_v12  ;;  %v566_v34 = vmul.f32 0.001, %v550_v33 }
 0x50d   :  { %v582_v13 = vsub.f32 %v1060_v19, %v566_v34 }
 0x50e   :  { %v551_v35 = vpop.trf.xlu0 }
 0x50f   :  { %598 = vst [vmem:[#allocation12 + $0x58] sm:$0xff] %v582_v13  ;;  %v567_v36 = vmul.f32 0.001, %v551_v35 }
 0x511   :  { %v583_v15 = vsub.f32 %v1064_v21, %v567_v36 }
 0x512   :  { %v552_v37 = vpop.trf.xlu0 }
 0x513   :  { %599 = vst [vmem:[#allocation12 + $0x60] sm:$0xff] %v583_v15  ;;  %v568_v38 = vmul.f32 0.001, %v552_v37 }
 0x515   :  { %v584_v16 = vsub.f32 %v1066_v22, %v568_v38 }
 0x516   :  { %v553_v39 = vpop.trf.xlu0 }
 0x517   :  { %600 = vst [vmem:[#allocation12 + $0x68] sm:$0xff] %v584_v16  ;;  %v569_v40 = vmul.f32 0.001, %v553_v39 }
 0x519   :  { %v585_v18 = vsub.f32 %v1070_v24, %v569_v40 }
 0x51a   :  { %v554_v41 = vpop.trf.xlu0 }
 0x51b   :  { %601 = vst [vmem:[#allocation12 + $0x70] sm:$0xff] %v585_v18  ;;  %v570_v19 = vmul.f32 0.001, %v554_v41 }
 0x51d   :  { %v586_v42 = vsub.f32 %v1072_v25, %v570_v19 }
 0x51f   :  { %602 = vst [vmem:[#allocation12 + $0x78] sm:$0xff] %v586_v42 }
 0x520   :  { %909 = shalt.err (!%p906_p3)
}
 0x521   :  { %s910_s27 = scalar_lea.hbm %s1164_s5, 2048 }
 0x522   :  { %p911_p4 = scmp.ne.s32.totalorder %s1164_s5, %s910_s27  ;;  %p914_p5 = scmp.lt.u32.totalorder %s910_s27, %s1164_s5 }
 0x524   :  { %p916_p6 = pnand %p914_p5, %p911_p4 }
 0x526   :  { %919 = shalt.err (!%p916_p6)
}
 0x527   :  { %637 = dma.vmem_to_hbm [thread:$0]  %s632_s4, 2048, %s1164_s5, [#allocation13], %s953_s7, %s953_s7, %s954_s8  }
 0x528   :  { %s920_s12 = scalar_lea.vmem %s645_s0, 16  ;;  %s924_s13 = scalar_lea.vmem %s645_s0, 32 }
 0x529   :  { %p921_p7 = scmp.ne.s32.totalorder %s645_s0, %s920_s12  ;;  %p925_p8 = scmp.lt.s32.totalorder %s645_s0, %s645_s0 }
 0x52a   :  { %p926_p9 = scmp.lt.s32.totalorder %s924_s13, %s920_s12 }
 0x52c   :  { %p927_p10 = por %p926_p9, %p925_p8 }
 0x52e   :  { %p928_p11 = pnand %p927_p10, %p921_p7 }
 0x530   :  { %931 = shalt.err (!%p928_p11)
}
 0x531   :  { %s932_s16 = scalar_lea.hbm %s1165_s6, 16 }
 0x532   :  { %p933_p12 = scmp.ne.s32.totalorder %s1165_s6, %s932_s16  ;;  %p936_p13 = scmp.lt.u32.totalorder %s932_s16, %s1165_s6 }
 0x534   :  { %p938_p0 = pnand %p936_p13, %p933_p12 }
 0x536   :  { %941 = shalt.err (!%p938_p0)
}
 0x537   :  { %647 = dma.vmem_to_hbm [thread:$0]  %s645_s0, 16, %s1165_s6, [#allocation13]  }
 0x538   :  { %946 = dma.done.wait [#allocation6], 128  }
 0x539   :  { %947 = vsyncadd [#allocation6], 4294967168 }
 0x53a   :  { %948 = dma.done.wait [#allocation7], 16  }
 0x53b   :  { %949 = vsyncadd [#allocation7], 4294967280 }
 0x53c   :  { %950 = dma.done.wait [#allocation13], 2064  }
 0x53d   :  { %951 = vsyncadd [#allocation13], 4294965232 }
 0x53e   :  { %660 = sfence }
 0x53f   :  { %661 = vsyncpa [#allocation5], 1 }
 0x540   :  { %662 = vsyncpa [#allocation9], 1 }
 0x541   :  { %663 = vsyncpa [#allocation6], 1 }
 0x542   :  { %664 = vsyncpa [#allocation13], 1 }
 0x543   :  { %665 = vsyncpa [#allocation7], 1 }

</bundles_post_ra>
